<compile_context>
chip_gen: v6e
topology: v6e:2x2x1
jax: 0.10.0
libtpu: 0.0.40
codegen_flags: <defaults>
</compile_context>

<pallas_src>
import jax
import jax.numpy as jnp
from jax.experimental import pallas as pl
from jax.experimental.pallas import tpu as pltpu


def _round_up(n: int, m: int) -> int:
    return ((n + m - 1) // m) * m


def _default_vmem_limit_bytes() -> int:
    """Per-generation VMEM limit: ~96 MiB on v5e/v6e (128 MiB physical),
    ~48 MiB on v7x (64 MiB physical)."""
    try:
        cap = int(pltpu.get_tpu_info().vmem_capacity_bytes)
    except Exception:  # pragma: no cover - conservative fallback
        cap = 64 * 1024 * 1024
    return max(32 * 1024 * 1024, min((cap * 3) // 4, 100 * 1024 * 1024))


def _mlp_kernel(x_ref, w1_ref, b1_ref, w2_ref, b2_ref, o_ref, acc_ref):
    """Grid = (batch_tiles, hidden_tiles). Hidden axis is a reduction into a
    resident f32 accumulator; ReLU is elementwise over hidden so the tiling is
    exact."""
    k = pl.program_id(1)

    @pl.when(k == 0)
    def _init():
        acc_ref[...] = jnp.zeros_like(acc_ref)

    # bf16 operands on the MXU, f32 accumulation; epilogue stays f32 on the VPU.
    x = x_ref[...].astype(w1_ref.dtype)
    h = jnp.dot(x, w1_ref[...], preferred_element_type=jnp.float32)
    h = jnp.maximum(h + b1_ref[...], 0.0)                       # (tb, hid_tile)
    acc_ref[...] += jnp.dot(h.astype(w2_ref.dtype), w2_ref[...],
                            preferred_element_type=jnp.float32)  # (tb, out_p)

    @pl.when(k == pl.num_programs(1) - 1)
    def _finalize():
        o_ref[...] = (acc_ref[...] + b2_ref[...]).astype(o_ref.dtype)


def prepare_params(w1, b1, w2, b2, *, param_dtype=jnp.bfloat16, lane_align=128):
    """Pad (lane-align hidden/out dims) and cast weights ONCE at init time.

    Padded hidden lanes get zero weight columns + zero bias (relu(0)=0) and
    zero w2 rows; padded out lanes get zero w2 columns + zero bias, so the
    slice-back in the forward pass is exact.  Biases stay f32 (f32 epilogue).
    """
    in_f, hidden = w1.shape
    out_f = w2.shape[1]
    hid_p = _round_up(hidden, lane_align)
    out_p = _round_up(out_f, lane_align)

    w1p = jnp.zeros((in_f, hid_p), param_dtype).at[:, :hidden].set(
        w1.astype(param_dtype))
    b1p = jnp.zeros((1, hid_p), jnp.float32).at[:, :hidden].set(
        b1.reshape(1, -1).astype(jnp.float32))
    w2p = jnp.zeros((hid_p, out_p), param_dtype).at[:hidden, :out_f].set(
        w2.astype(param_dtype))
    b2p = jnp.zeros((1, out_p), jnp.float32).at[:, :out_f].set(
        b2.reshape(1, -1).astype(jnp.float32))
    return (w1p, b1p, w2p, b2p), out_f


def simple_nn_forward(x, padded_params, out_features, *,
                      out_dtype=jnp.float32,
                      max_block_b=256, max_block_hidden=512):
    """Fused y = relu(x @ w1 + b1) @ w2 + b2 with pre-padded bf16 weights."""
    w1p, b1p, w2p, b2p = padded_params
    batch, in_f = x.shape
    assert w1p.shape[0] == in_f, "x / w1 inner-dim mismatch"
    hid_p = w1p.shape[1]
    out_p = w2p.shape[1]

    # Batch tile: multiple of 8 sublanes, capped; if the whole batch fits in a
    # single tile, halve it (keeping >=8 rows) so v7x's 2nd TensorCore has work.
    tb = min(_round_up(batch, 8), max_block_b)
    num_b = pl.cdiv(batch, tb)
    if num_b == 1 and tb >= 16:
        tb = _round_up((tb + 1) // 2, 8)
        num_b = pl.cdiv(batch, tb)

    # Hidden reduction tile: 128-multiple that divides hid_p exactly.
    hid_tile = min(hid_p, _round_up(max_block_hidden, 128))
    while hid_p % hid_tile:
        hid_tile -= 128
    num_k = hid_p // hid_tile

    grid = (num_b, num_k)

    flops = 2 * batch * (in_f * hid_p + hid_p * out_p)
    bytes_accessed = (
        batch * in_f * jnp.dtype(x.dtype).itemsize
        + w1p.size * jnp.dtype(w1p.dtype).itemsize
        + b1p.size * 4
        + w2p.size * jnp.dtype(w2p.dtype).itemsize
        + b2p.size * 4
        + batch * out_p * jnp.dtype(out_dtype).itemsize)

    yp = pl.pallas_call(
        _mlp_kernel,
        out_shape=jax.ShapeDtypeStruct((batch, out_p), out_dtype),
        grid=grid,
        in_specs=[
            pl.BlockSpec((tb, in_f), lambda i, k: (i, 0)),        # x (full in_f)
            pl.BlockSpec((in_f, hid_tile), lambda i, k: (0, k)),  # w1 col slab
            pl.BlockSpec((1, hid_tile), lambda i, k: (0, k)),     # b1 slab
            pl.BlockSpec((hid_tile, out_p), lambda i, k: (k, 0)), # w2 row slab
            pl.BlockSpec((1, out_p), lambda i, k: (0, 0)),        # b2 resident
        ],
        out_specs=pl.BlockSpec((tb, out_p), lambda i, k: (i, 0)),
        scratch_shapes=[pltpu.VMEM((tb, out_p), jnp.float32)],    # f32 accumulator
        compiler_params=pltpu.CompilerParams(
            dimension_semantics=("parallel", "arbitrary"),
            vmem_limit_bytes=_default_vmem_limit_bytes(),
        ),
        cost_estimate=pl.CostEstimate(
            flops=flops, transcendentals=0, bytes_accessed=bytes_accessed),
    )(x, w1p, b1p, w2p, b2p)

    return yp[:, :out_features]


def init_params(key, in_features, hidden, out_features):
    """Deterministic PyTorch-style (uniform +-1/sqrt(fan_in)) init."""
    k1, k2, k3, k4 = jax.random.split(key, 4)
    bound1 = 1.0 / (in_features ** 0.5)
    bound2 = 1.0 / (hidden ** 0.5)
    w1 = jax.random.uniform(k1, (in_features, hidden), jnp.float32, -bound1, bound1)
    b1 = jax.random.uniform(k2, (1, hidden), jnp.float32, -bound1, bound1)
    w2 = jax.random.uniform(k3, (hidden, out_features), jnp.float32, -bound2, bound2)
    b2 = jax.random.uniform(k4, (1, out_features), jnp.float32, -bound2, bound2)
    return w1, b1, w2, b2


if __name__ == "__main__":
    key = jax.random.PRNGKey(0)
    kx, kp = jax.random.split(key)

    batch, in_features, hidden, out_features = 8, 16, 32, 8
    x = jax.random.normal(kx, (batch, in_features), jnp.float32)
    w1, b1, w2, b2 = init_params(kp, in_features, hidden, out_features)

    # Padding + bf16 cast hoisted out of the forward pass (done once at init).
    params, out_f = prepare_params(w1, b1, w2, b2)
    fwd = jax.jit(lambda xx: simple_nn_forward(xx, params, out_f))

    y = fwd(x)
    jax.block_until_ready(y)

    # Reference check in plain f32 JAX.  Kernel uses bf16 operands with f32
    # accumulation, so tolerance is loosened accordingly.
    y_ref = jnp.maximum(x @ w1 + b1, 0.0) @ w2 + b2
    assert y.shape == y_ref.shape, "shape mismatch vs reference"
    assert jnp.allclose(y, y_ref, atol=5e-2, rtol=5e-2), "mismatch vs reference"

    print("KERNEL_OK")
</pallas_src>

<mosaic_0001>
module attributes {stable_mosaic.version = 11 : i64} {
  func.func @_mlp_kernel(%arg0: i32, %arg1: i32, %arg2: memref<8x16xf32, #tpu.memory_space<vmem>>, %arg3: memref<16x128xbf16, #tpu.memory_space<vmem>>, %arg4: memref<1x128xf32, #tpu.memory_space<vmem>>, %arg5: memref<128x128xbf16, #tpu.memory_space<vmem>>, %arg6: memref<1x128xf32, #tpu.memory_space<vmem>>, %arg7: memref<8x128xf32, #tpu.memory_space<vmem>>, %arg8: memref<8x128xf32, #tpu.memory_space<vmem>>) attributes {dimension_semantics = [#tpu.dimension_semantics<parallel>, #tpu.dimension_semantics<arbitrary>], iteration_bounds = array<i64: 1, 1>, scalar_prefetch = 0 : i64, scratch_operands = 1 : i64, tpu.core_type = #tpu.core_type<tc>, window_params = [{transform_indices = @transform_0, window_bounds = array<i64: 8, 16>}, {transform_indices = @transform_1, window_bounds = array<i64: 16, 128>}, {transform_indices = @transform_2, window_bounds = array<i64: 1, 128>}, {transform_indices = @transform_3, window_bounds = array<i64: 128, 128>}, {pipeline_mode = #tpu.pipeline_mode<synchronous>, transform_indices = @transform_4, window_bounds = array<i64: 1, 128>}, {transform_indices = @transform_5, window_bounds = array<i64: 8, 128>}]} {
    %c0_i32 = arith.constant 0 : i32
    %0 = arith.cmpi eq, %arg1, %c0_i32 : i32
    %1 = arith.extui %0 : i1 to i32
    %c0_i32_0 = arith.constant 0 : i32
    %2 = arith.cmpi ne, %1, %c0_i32_0 : i32
    scf.if %2 {
      %cst_16 = arith.constant 0.000000e+00 : f32
      %21 = vector.broadcast %cst_16 : f32 to vector<8x128xf32>
      %c0_17 = arith.constant 0 : index
      %c0_18 = arith.constant 0 : index
      %22 = vector.load %arg8[%c0_17, %c0_18] : memref<8x128xf32, #tpu.memory_space<vmem>>, vector<8x128xf32>
      tpu.vector_store %arg8[%c0_17, %c0_18], %21 {strides = array<i32>} : memref<8x128xf32, #tpu.memory_space<vmem>>, vector<8x128xf32>,
    } else {
    }
    %c0 = arith.constant 0 : index
    %c0_1 = arith.constant 0 : index
    %3 = vector.load %arg2[%c0, %c0_1] : memref<8x16xf32, #tpu.memory_space<vmem>>, vector<8x16xf32>
    %4 = arith.truncf %3 : vector<8x16xf32> to vector<8x16xbf16>
    %c0_2 = arith.constant 0 : index
    %c0_3 = arith.constant 0 : index
    %5 = vector.load %arg3[%c0_2, %c0_3] : memref<16x128xbf16, #tpu.memory_space<vmem>>, vector<16x128xbf16>
    %cst = arith.constant dense<0.000000e+00> : vector<8x128xf32>
    %6 = tpu.matmul %4, %5, %cst {dimension_numbers = #tpu.dot_dimension_numbers<[1], [0], [0], [1], [0, 0, 1, 1], [], []>} : vector<8x16xbf16>, vector<16x128xbf16>, vector<8x128xf32> -> vector<8x128xf32>
    %c0_4 = arith.constant 0 : index
    %c0_5 = arith.constant 0 : index
    %7 = vector.load %arg4[%c0_4, %c0_5] : memref<1x128xf32, #tpu.memory_space<vmem>>, vector<1x128xf32>
    %8 = vector.broadcast %7 : vector<1x128xf32> to vector<8x128xf32>
    %9 = arith.addf %6, %8 : vector<8x128xf32>
    %cst_6 = arith.constant 0.000000e+00 : f32
    %10 = vector.broadcast %cst_6 : f32 to vector<8x128xf32>
    %11 = arith.maximumf %9, %10 : vector<8x128xf32>
    %c0_7 = arith.constant 0 : index
    %c0_8 = arith.constant 0 : index
    %12 = vector.load %arg8[%c0_7, %c0_8] : memref<8x128xf32, #tpu.memory_space<vmem>>, vector<8x128xf32>
    %13 = arith.truncf %11 : vector<8x128xf32> to vector<8x128xbf16>
    %c0_9 = arith.constant 0 : index
    %c0_10 = arith.constant 0 : index
    %14 = vector.load %arg5[%c0_9, %c0_10] : memref<128x128xbf16, #tpu.memory_space<vmem>>, vector<128x128xbf16>
    %cst_11 = arith.constant dense<0.000000e+00> : vector<8x128xf32>
    %15 = tpu.matmul %13, %14, %cst_11 {dimension_numbers = #tpu.dot_dimension_numbers<[1], [0], [0], [1], [0, 0, 1, 1], [], []>} : vector<8x128xbf16>, vector<128x128xbf16>, vector<8x128xf32> -> vector<8x128xf32>
    %16 = arith.addf %12, %15 : vector<8x128xf32>
    %c0_12 = arith.constant 0 : index
    %c0_13 = arith.constant 0 : index
    %17 = vector.load %arg8[%c0_12, %c0_13] : memref<8x128xf32, #tpu.memory_space<vmem>>, vector<8x128xf32>
    tpu.vector_store %arg8[%c0_12, %c0_13], %16 {strides = array<i32>} : memref<8x128xf32, #tpu.memory_space<vmem>>, vector<8x128xf32>,
    %c0_i32_14 = arith.constant 0 : i32
    %18 = arith.cmpi eq, %arg1, %c0_i32_14 : i32
    %19 = arith.extui %18 : i1 to i32
    %c0_i32_15 = arith.constant 0 : i32
    %20 = arith.cmpi ne, %19, %c0_i32_15 : i32
    scf.if %20 {
      %c0_16 = arith.constant 0 : index
      %c0_17 = arith.constant 0 : index
      %21 = vector.load %arg8[%c0_16, %c0_17] : memref<8x128xf32, #tpu.memory_space<vmem>>, vector<8x128xf32>
      %c0_18 = arith.constant 0 : index
      %c0_19 = arith.constant 0 : index
      %22 = vector.load %arg6[%c0_18, %c0_19] : memref<1x128xf32, #tpu.memory_space<vmem>>, vector<1x128xf32>
      %23 = vector.broadcast %22 : vector<1x128xf32> to vector<8x128xf32>
      %24 = arith.addf %21, %23 : vector<8x128xf32>
      %c0_20 = arith.constant 0 : index
      %c0_21 = arith.constant 0 : index
      %25 = vector.load %arg7[%c0_20, %c0_21] : memref<8x128xf32, #tpu.memory_space<vmem>>, vector<8x128xf32>
      tpu.vector_store %arg7[%c0_20, %c0_21], %24 {strides = array<i32>} : memref<8x128xf32, #tpu.memory_space<vmem>>, vector<8x128xf32>,
    } else {
    }
    return
  }
  func.func @transform_0(%arg0: i32, %arg1: i32) -> (i32, i32) {
    %c0_i32 = arith.constant 0 : i32
    %c0_i32_0 = arith.constant 0 : i32
    return %arg0, %c0_i32 : i32, i32
  }
  func.func @transform_1(%arg0: i32, %arg1: i32) -> (i32, i32) {
    %c0_i32 = arith.constant 0 : i32
    %c0_i32_0 = arith.constant 0 : i32
    return %c0_i32, %arg1 : i32, i32
  }
  func.func @transform_2(%arg0: i32, %arg1: i32) -> (i32, i32) {
    %c0_i32 = arith.constant 0 : i32
    %c0_i32_0 = arith.constant 0 : i32
    return %c0_i32, %arg1 : i32, i32
  }
  func.func @transform_3(%arg0: i32, %arg1: i32) -> (i32, i32) {
    %c0_i32 = arith.constant 0 : i32
    %c0_i32_0 = arith.constant 0 : i32
    return %arg1, %c0_i32 : i32, i32
  }
  func.func @transform_4(%arg0: i32, %arg1: i32) -> (i32, i32) {
    %c0_i32 = arith.constant 0 : i32
    %c0_i32_0 = arith.constant 0 : i32
    %c0_i32_1 = arith.constant 0 : i32
    return %c0_i32, %c0_i32_0 : i32, i32
  }
  func.func @transform_5(%arg0: i32, %arg1: i32) -> (i32, i32) {
    %c0_i32 = arith.constant 0 : i32
    %c0_i32_0 = arith.constant 0 : i32
    return %arg0, %c0_i32 : i32, i32
  }
}

</mosaic_0001>

<bundles_post_ra>
// kernel: _lambda_.1
= control target key start
LH: loop header
LB: loop body
LE: loop exit
PB: predicated region body
PF: predicated region fallthrough
CT: control target
= control target key end

     0   :  { %10 = vsyncpa [#allocation4], 0  ;;  %s473_s0 = inlined_call_operand.hbm [shape: f32[8,16], index: 0, kind: input, shape index: {}]   ;;  %s474_s1 = inlined_call_operand.hbm [shape: bf16[16,128], index: 1, kind: input, shape index: {}]   ;;  %s475_s2 = inlined_call_operand.vmem [shape: f32[1,128], index: 2, kind: input, shape index: {}]   ;;  %s476_s3 = inlined_call_operand.hbm [shape: bf16[128,128], index: 3, kind: input, shape index: {}]   ;;  %s477_s4 = inlined_call_operand.vmem [shape: f32[1,128], index: 4, kind: input, shape index: {}]   ;;  %s478_s5 = inlined_call_operand.hbm [shape: f32[8,128], index: 5, kind: output, shape index: {}]  }
   0x1   :  { %11 = vsyncpa [#allocation7], 0 }
   0x2   :  { %12 = vsyncpa [#allocation5], 0  ;;  %s417_s18 = smov [#allocation6]  }
   0x3   :  { %s28_s19 = sshll.u32 %s417_s18, 4  ;;  %s29_s19 = int_to_ptr.vmem [resolvable:$true] %s28_s19 }
   0x4   :  { %s339_s20 = scalar_lea.vmem %s29_s19, 128  ;;  %p344_p1 = scmp.lt.s32.totalorder %s29_s19, %s29_s19 }
   0x5   :  { %p340_p0 = scmp.ne.s32.totalorder %s29_s19, %s339_s20  ;;  %p345_p2 = scmp.lt.s32.totalorder %s339_s20, %s339_s20 }
   0x7   :  { %p346_p3 = por %p345_p2, %p344_p1 }
   0x9   :  { %p347_p4 = pnand %p346_p3, %p340_p0 }
   0xb   :  { %350 = shalt.err (!%p347_p4)
}
   0xc   :  { %s418_s21 = smov 64   ;;  %s419_s22 = smov 4  }
   0xd   :  { %34 = dma.hbm_to_vmem [thread:$0]  %s474_s1, 128, %s29_s19, [#allocation7], %s418_s21, %s418_s21, %s419_s22  }
   0xe   :  { %s420_s25 = smov [#allocation3]   ;;  %s421_s27 = smov [#allocation8]  }
   0xf   :  { %s19_s26 = sshll.u32 %s420_s25, 4  ;;  %s42_s28 = sshll.u32 %s421_s27, 4  ;;  %s20_s26 = int_to_ptr.vmem [resolvable:$true] %s19_s26  ;;  %s43_s28 = int_to_ptr.vmem [resolvable:$true] %s42_s28 }
  0x10   :  { %s359_s29 = scalar_lea.vmem %s20_s26, 128  ;;  %p364_p6 = scmp.lt.s32.totalorder %s20_s26, %s20_s26 }
  0x11   :  { %p360_p5 = scmp.ne.s32.totalorder %s20_s26, %s359_s29  ;;  %p365_p7 = scmp.lt.s32.totalorder %s359_s29, %s359_s29 }
  0x13   :  { %p366_p8 = por %p365_p7, %p364_p6 }
  0x15   :  { %p367_p9 = pnand %p366_p8, %p360_p5 }
  0x17   :  { %370 = shalt.err (!%p367_p9)
}
  0x18   :  { %22 = dma.hbm_to_vmem [thread:$0]  %s473_s0, 128, %s20_s26, [#allocation4]  }
  0x19   :  { %s379_s7 = scalar_lea.vmem %s43_s28, 1024  ;;  %p384_p11 = scmp.lt.s32.totalorder %s43_s28, %s43_s28 }
  0x1a   :  { %p380_p10 = scmp.ne.s32.totalorder %s43_s28, %s379_s7  ;;  %p385_p12 = scmp.lt.s32.totalorder %s379_s7, %s379_s7 }
  0x1c   :  { %p386_p13 = por %p385_p12, %p384_p11 }
  0x1e   :  { %p387_p0 = pnand %p386_p13, %p380_p10 }
  0x20   :  { %390 = shalt.err (!%p387_p0)
}
  0x21   :  { %48 = dma.hbm_to_vmem [thread:$0]  %s476_s3, 1024, %s43_s28, [#allocation7], %s418_s21, %s418_s21, %s419_s22  }
  0x22   :  { %411 = dma.done.wait [#allocation4], 128  }
  0x23   :  { %412 = vsyncadd [#allocation4], 4294967168 }
  0x24   :  { %413 = dma.done.wait [#allocation7], 1152  }
  0x25   :  { %414 = vsyncadd [#allocation7], 4294966144  ;;  %v422_v0 = vmov 0.0   ;;  %vm423_vm0 = vmmov 0   ;;  %v322_v1 = vld [vmem:[#allocation6] sm:$0xff]   ;;  %v66_v2 = vld [vmem:[#allocation3] sm:$0xff] }
  0x26   :  { %288 = vmatprep.subr.bf16.mxu0 %v422_v0  ;;  %290 = vmatprep.mubr.msk.bf16.mxu0 %vm423_vm0, %v422_v0  ;;  %v67_v3 = vpack.c.bf16 %v66_v2, %v66_v2  ;;  %vm83_vm1 = vcmask 130048   ;;  %v323_v4 = vld [vmem:[#allocation8 + $0x38] sm:$0xff]   ;;  %v324_v5 = vld [vmem:[#allocation8 + $0x30] sm:$0xff]   ;;  %v325_v6 = vld [vmem:[#allocation8 + $0x28] sm:$0xff]   ;;  %s424_s11 = smov [#allocation9]  }
  0x27   :  { %294 = vmatprep.subr.bf16.mxu1 %v422_v0  ;;  %310 = vmatprep.mubr.msk.bf16.mxu1 %vm423_vm0, %v422_v0  ;;  %v326_v7 = vld [vmem:[#allocation8 + $0x20] sm:$0xff]   ;;  %v327_v8 = vld [vmem:[#allocation8 + $0x18] sm:$0xff]   ;;  %v328_v9 = vld [vmem:[#allocation8 + $0x10] sm:$0xff]   ;;  %s255_s12 = sshll.u32 %s424_s11, 4  ;;  %s256_s12 = int_to_ptr.vmem [resolvable:$true] %s255_s12 }
  0x28   :  { %289 = vmatpush3.bf16.msra.mxu0 %v322_v1  ;;  %295 = vmatpush3.bf16.msra.mxu1 %v323_v4  ;;  %v329_v10 = vld [vmem:[#allocation8 + $0x8] sm:$0xff]   ;;  %v330_v11 = vld [vmem:[#allocation8] sm:$0xff]   ;;  %v265_v12 = vld [vmem:[%s475_s2] ss:$0 sm:$0xff]  ;;  %s391_s2 = scalar_lea.vmem %s256_s12, 128  ;;  %p396_p2 = scmp.lt.s32.totalorder %s256_s12, %s256_s12 }
  0x29   :  { %296 = vmatprep.subr.bf16.mxu1 %v422_v0  ;;  %v276_v20 = vld [vmem:[%s477_s4] ss:$0 sm:$0xff]  ;;  %p392_p1 = scmp.ne.s32.totalorder %s256_s12, %s391_s2  ;;  %p397_p3 = scmp.lt.s32.totalorder %s391_s2, %s391_s2 }
  0x2b   :  { %291 = vmatmul.mubr.msk.bf16.vlgmr.msra.gmra.mxu0 %vm83_vm1, %v67_v3  ;;  %p398_p4 = por %p397_p3, %p396_p2 }
  0x2c   :  { %297 = vmatpush3.bf16.msra.mxu1 %v324_v5 }
  0x2d   :  { %298 = vmatprep.subr.bf16.mxu1 %v422_v0  ;;  %p399_p5 = pnand %p398_p4, %p392_p1 }
  0x30   :  { %299 = vmatpush3.bf16.msra.mxu1 %v325_v6 }
  0x31   :  { %300 = vmatprep.subr.bf16.mxu1 %v422_v0 }
  0x34   :  { %301 = vmatpush3.bf16.msra.mxu1 %v326_v7 }
  0x35   :  { %302 = vmatprep.subr.bf16.mxu1 %v422_v0 }
  0x38   :  { %303 = vmatpush3.bf16.msra.mxu1 %v327_v8 }
  0x39   :  { %304 = vmatprep.subr.bf16.mxu1 %v422_v0 }
  0x3c   :  { %305 = vmatpush3.bf16.msra.mxu1 %v328_v9 }
  0x3d   :  { %306 = vmatprep.subr.bf16.mxu1 %v422_v0 }
  0x40   :  { %307 = vmatpush3.bf16.msra.mxu1 %v329_v10 }
  0x41   :  { %308 = vmatprep.subr.bf16.mxu1 %v422_v0 }
  0x44   :  { %309 = vmatpush3.bf16.msra.mxu1 %v330_v11 }
  0xeb   :  { %v121_v13 = vpop.f32.mrf.mxu0 }
  0xec   :  { %v122_v14 = vadd.f32 %v265_v12, %v121_v13 }
  0xed   :  { %v292_v15 = vpop.f32.mrf.mxu0 }
  0xee   :  { %v127_v16 = vmax.f32 %v122_v14, 0.0 }
  0xef   :  { %v124_v17 = vpop.f32.mrf.mxu0 }
  0xf0   :  { %v129_v18 = vpack.c.bf16 %v127_v16, %v127_v16 }
  0xf1   :  { %v293_v19 = vpop.f32.mrf.mxu0 }
  0xf2   :  { %311 = vmatmul.mubr.bf16.vlgmr.msra.gmra.mxu1 %v129_v18 }
 0x1b2   :  { %v228_v21 = vpop.f32.mrf.mxu1 }
 0x1b3   :  { %v247_v22 = vadd.f32 %v276_v20, %v228_v21 }
 0x1b4   :  { %v312_v23 = vpop.f32.mrf.mxu1 }
 0x1b5   :  { %248 = vst [vmem:[#allocation9] sm:$0xff] %v247_v22 }
 0x1b6   :  { %v231_v24 = vpop.f32.mrf.mxu1 }
 0x1b7   :  { %402 = shalt.err (!%p399_p5)
}
 0x1b8   :  { %258 = dma.vmem_to_hbm [thread:$0]  %s256_s12, 128, %s478_s5, [#allocation5]   ;;  %v313_v25 = vpop.f32.mrf.mxu1 }
 0x1b9   :  { %415 = dma.done.wait [#allocation5], 128  }
 0x1ba   :  { %416 = vsyncadd [#allocation5], 4294967168 }
 0x1bb   :  { %262 = vsyncpa [#allocation4], 1 }
 0x1bc   :  { %263 = vsyncpa [#allocation7], 1 }
 0x1bd   :  { %264 = vsyncpa [#allocation5], 1 }

</bundles_post_ra>
